<compile_context>
chip_gen: v7x
topology: tpu7x:2x2x1
jax: 0.10.0
libtpu: 0.0.40
codegen_flags: <defaults>
</compile_context>

<pallas_src>
import jax
import jax.numpy as jnp
from jax.experimental import pallas as pl
from jax.experimental.pallas import tpu as pltpu


# ----------------------------- Pallas kernel ------------------------------ #
def gcn_fused_kernel(a_ref, x_ref, w1_ref, b1_ref, w2_ref, b2_ref, o_ref):
    """Fused 2-layer GCN: out = A @ relu(A @ (X W1) + b1) W2 + b2.

    All operands are f32 whole-array VMEM tiles; matmuls accumulate in f32 on
    the MXU; bias/ReLU epilogues run in f32 on the VPU. The [N, hidden]
    intermediate h1 never leaves vregs/VMEM.
    """
    # ---- Layer 1: h1 = relu(A_norm @ (X @ W1) + b1) ----
    xw1 = jnp.dot(x_ref[...], w1_ref[...], preferred_element_type=jnp.float32)
    h1 = jnp.dot(a_ref[...], xw1, preferred_element_type=jnp.float32)
    h1 = jnp.maximum(h1 + b1_ref[...], 0.0)
    # dropout(p=0.5) is identity in eval mode.

    # ---- Layer 2: out = A_norm @ (h1 @ W2) + b2 ----
    hw2 = jnp.dot(h1, w2_ref[...], preferred_element_type=jnp.float32)
    out = jnp.dot(a_ref[...], hw2, preferred_element_type=jnp.float32)
    o_ref[...] = (out + b2_ref[...]).astype(o_ref.dtype)


def gcn_fused(a_norm, x, p):
    """Single grid-less pallas_call over whole-array VMEM blocks."""
    n, f_in = x.shape
    h = p["w1"].shape[1]
    c = p["w2"].shape[1]
    flops = 2 * (n * f_in * h + n * n * h + n * h * c + n * n * c)
    bytes_accessed = 4 * (n * n + n * f_in + f_in * h + h + h * c + c + n * c)
    vmem_spec = pl.BlockSpec(memory_space=pltpu.MemorySpace.VMEM)
    return pl.pallas_call(
        gcn_fused_kernel,
        out_shape=jax.ShapeDtypeStruct((n, c), jnp.float32),
        in_specs=[vmem_spec] * 6,   # A_norm, X, W1, b1, W2, b2 (all f32)
        out_specs=vmem_spec,
        cost_estimate=pl.CostEstimate(
            flops=flops, transcendentals=0, bytes_accessed=bytes_accessed),
    )(a_norm, x, p["w1"], p["b1"], p["w2"], p["b2"])


# ------------------------------- JAX glue --------------------------------- #
def build_normalized_adjacency(edge_index, num_nodes):
    """Dense D^{-1/2}(A + I_missing)D^{-1/2} from a [2, E] edge_index.

    Matches torch_geometric gcn_norm: a weight-1 self-loop is only added for
    nodes that do not already have one (add_remaining_self_loops).
    Computed ONCE for a static graph and reused across forwards.
    """
    src, dst = edge_index[0], edge_index[1]
    a = jnp.zeros((num_nodes, num_nodes), jnp.float32)
    # message flows source -> target: A[target, source] accumulates weight 1
    a = a.at[dst, src].add(1.0)
    diag = jnp.diagonal(a)
    a_hat = a + jnp.diag(jnp.where(diag > 0.0, 0.0, 1.0))
    deg = jnp.sum(a_hat, axis=1)
    d_inv_sqrt = jnp.where(deg > 0, jax.lax.rsqrt(deg), 0.0)
    return d_inv_sqrt[:, None] * a_hat * d_inv_sqrt[None, :]


def prepare_params(params):
    """Reshape biases to (1, dim) row vectors for in-kernel broadcasting."""
    return {
        "w1": params["w1"].astype(jnp.float32),
        "b1": params["b1"].reshape(1, -1).astype(jnp.float32),
        "w2": params["w2"].astype(jnp.float32),
        "b2": params["b2"].reshape(1, -1).astype(jnp.float32),
    }


@jax.jit
def gcn_forward(x, a_norm, prepped):
    return gcn_fused(a_norm, x.astype(jnp.float32), prepped)


def gcn_reference(x, a_norm, params):
    """Pure-JAX f32 reference (HIGHEST precision) for a sanity check."""
    hp = jax.lax.Precision.HIGHEST
    h = jnp.dot(a_norm, jnp.dot(x, params["w1"], precision=hp),
                precision=hp) + params["b1"]
    h = jnp.maximum(h, 0.0)
    return jnp.dot(a_norm, jnp.dot(h, params["w2"], precision=hp),
                   precision=hp) + params["b2"]


def init_params(key, num_features, hidden, num_classes):
    k1, k2 = jax.random.split(key)
    w1 = jax.random.uniform(
        k1, (num_features, hidden), jnp.float32, -1.0, 1.0
    ) * jnp.sqrt(6.0 / (num_features + hidden))
    w2 = jax.random.uniform(
        k2, (hidden, num_classes), jnp.float32, -1.0, 1.0
    ) * jnp.sqrt(6.0 / (hidden + num_classes))
    b1 = jnp.zeros((hidden,), jnp.float32)
    b2 = jnp.zeros((num_classes,), jnp.float32)
    return {"w1": w1, "b1": b1, "w2": w2, "b2": b2}


if __name__ == "__main__":
    # Small synthetic "Planetoid-like" graph.
    NUM_NODES = 128
    NUM_FEATURES = 32
    HIDDEN = 16
    NUM_CLASSES = 8
    NUM_EDGES = 512

    key = jax.random.PRNGKey(0)
    k_x, k_e1, k_e2, k_p = jax.random.split(key, 4)

    x = jax.random.normal(k_x, (NUM_NODES, NUM_FEATURES), jnp.float32)
    src = jax.random.randint(k_e1, (NUM_EDGES,), 0, NUM_NODES, jnp.int32)
    dst = jax.random.randint(k_e2, (NUM_EDGES,), 0, NUM_NODES, jnp.int32)
    edge_index = jnp.stack([src, dst], axis=0)  # [2, E]

    params = init_params(k_p, NUM_FEATURES, HIDDEN, NUM_CLASSES)

    # Hoisted one-time preprocessing for the static graph / static weights.
    a_norm = build_normalized_adjacency(edge_index, NUM_NODES)
    prepped = prepare_params(params)

    out = gcn_forward(x, a_norm, prepped)
    jax.block_until_ready(out)
    assert out.shape == (NUM_NODES, NUM_CLASSES)
    assert out.dtype == jnp.float32

    # f32 end-to-end: tolerance only needs to cover MXU pass-precision details.
    ref = gcn_reference(x, a_norm, params)
    max_abs_ref = float(jnp.max(jnp.abs(ref)))
    max_err = float(jnp.max(jnp.abs(out - ref)))
    assert max_err <= 2e-2 * max_abs_ref + 1e-3, (max_err, max_abs_ref)

    print("KERNEL_OK")
</pallas_src>

<mosaic_0001>
module attributes {stable_mosaic.version = 11 : i64} {
  func.func @gcn_fused_kernel(%arg0: memref<128x128xf32, #tpu.memory_space<vmem>>, %arg1: memref<128x32xf32, #tpu.memory_space<vmem>>, %arg2: memref<32x16xf32, #tpu.memory_space<vmem>>, %arg3: memref<1x16xf32, #tpu.memory_space<vmem>>, %arg4: memref<16x8xf32, #tpu.memory_space<vmem>>, %arg5: memref<1x8xf32, #tpu.memory_space<vmem>>, %arg6: memref<128x8xf32, #tpu.memory_space<vmem>>) attributes {dimension_semantics = [], scalar_prefetch = 0 : i64, scratch_operands = 0 : i64, tpu.core_type = #tpu.core_type<tc>} {
    %c0 = arith.constant 0 : index
    %c0_0 = arith.constant 0 : index
    %0 = vector.load %arg1[%c0, %c0_0] : memref<128x32xf32, #tpu.memory_space<vmem>>, vector<128x32xf32>
    %c0_1 = arith.constant 0 : index
    %c0_2 = arith.constant 0 : index
    %1 = vector.load %arg2[%c0_1, %c0_2] : memref<32x16xf32, #tpu.memory_space<vmem>>, vector<32x16xf32>
    %cst = arith.constant dense<0.000000e+00> : vector<128x16xf32>
    %2 = tpu.matmul %0, %1, %cst {dimension_numbers = #tpu.dot_dimension_numbers<[1], [0], [0], [1], [0, 0, 1, 1], [], []>} : vector<128x32xf32>, vector<32x16xf32>, vector<128x16xf32> -> vector<128x16xf32>
    %c0_3 = arith.constant 0 : index
    %c0_4 = arith.constant 0 : index
    %3 = vector.load %arg0[%c0_3, %c0_4] : memref<128x128xf32, #tpu.memory_space<vmem>>, vector<128x128xf32>
    %cst_5 = arith.constant dense<0.000000e+00> : vector<128x16xf32>
    %4 = tpu.matmul %3, %2, %cst_5 {dimension_numbers = #tpu.dot_dimension_numbers<[1], [0], [0], [1], [0, 0, 1, 1], [], []>} : vector<128x128xf32>, vector<128x16xf32>, vector<128x16xf32> -> vector<128x16xf32>
    %c0_6 = arith.constant 0 : index
    %c0_7 = arith.constant 0 : index
    %5 = vector.load %arg3[%c0_6, %c0_7] : memref<1x16xf32, #tpu.memory_space<vmem>>, vector<1x16xf32>
    %6 = vector.broadcast %5 : vector<1x16xf32> to vector<128x16xf32>
    %7 = arith.addf %4, %6 : vector<128x16xf32>
    %cst_8 = arith.constant 0.000000e+00 : f32
    %8 = vector.broadcast %cst_8 : f32 to vector<128x16xf32>
    %9 = arith.maximumf %7, %8 : vector<128x16xf32>
    %c0_9 = arith.constant 0 : index
    %c0_10 = arith.constant 0 : index
    %10 = vector.load %arg4[%c0_9, %c0_10] : memref<16x8xf32, #tpu.memory_space<vmem>>, vector<16x8xf32>
    %cst_11 = arith.constant dense<0.000000e+00> : vector<128x8xf32>
    %11 = tpu.matmul %9, %10, %cst_11 {dimension_numbers = #tpu.dot_dimension_numbers<[1], [0], [0], [1], [0, 0, 1, 1], [], []>} : vector<128x16xf32>, vector<16x8xf32>, vector<128x8xf32> -> vector<128x8xf32>
    %c0_12 = arith.constant 0 : index
    %c0_13 = arith.constant 0 : index
    %12 = vector.load %arg0[%c0_12, %c0_13] : memref<128x128xf32, #tpu.memory_space<vmem>>, vector<128x128xf32>
    %cst_14 = arith.constant dense<0.000000e+00> : vector<128x8xf32>
    %13 = tpu.matmul %12, %11, %cst_14 {dimension_numbers = #tpu.dot_dimension_numbers<[1], [0], [0], [1], [0, 0, 1, 1], [], []>} : vector<128x128xf32>, vector<128x8xf32>, vector<128x8xf32> -> vector<128x8xf32>
    %c0_15 = arith.constant 0 : index
    %c0_16 = arith.constant 0 : index
    %14 = vector.load %arg5[%c0_15, %c0_16] : memref<1x8xf32, #tpu.memory_space<vmem>>, vector<1x8xf32>
    %15 = vector.broadcast %14 : vector<1x8xf32> to vector<128x8xf32>
    %16 = arith.addf %13, %15 : vector<128x8xf32>
    %c0_17 = arith.constant 0 : index
    %c0_18 = arith.constant 0 : index
    %17 = vector.load %arg6[%c0_17, %c0_18] : memref<128x8xf32, #tpu.memory_space<vmem>>, vector<128x8xf32>
    tpu.vector_store %arg6[%c0_17, %c0_18], %16 {strides = array<i32>} : memref<128x8xf32, #tpu.memory_space<vmem>>, vector<128x8xf32>,
    return
  }
}

</mosaic_0001>

<bundles_post_ra>
// kernel: gcn_forward.1
= control target key start
LH: loop header
LB: loop body
LE: loop exit
PB: predicated region body
PF: predicated region fallthrough
CT: control target
= control target key end

     0   :  { %vm43_vm0 = vcmask 261120   ;;  %vm423_vm1 = vcmask 130048   ;;  %vm769_vm2 = vcmask 64512   ;;  %s1501_s2 = inlined_call_operand.vmem [shape: f32[32,16], index: 2, kind: input, shape index: {}]   ;;  %s1502_s1 = inlined_call_operand.vmem [shape: f32[128,32], index: 1, kind: input, shape index: {}]   ;;  %s1503_s0 = inlined_call_operand.vmem [shape: f32[128,128], index: 0, kind: input, shape index: {}]   ;;  %s1504_s4 = inlined_call_operand.vmem [shape: f32[16,8], index: 4, kind: input, shape index: {}]   ;;  %s1505_s3 = inlined_call_operand.vmem [shape: f32[1,16], index: 3, kind: input, shape index: {}]   ;;  %s1506_s5 = inlined_call_operand.vmem [shape: f32[1,8], index: 5, kind: input, shape index: {}]   ;;  %s1507_s6 = inlined_call_operand.vmem [shape: f32[128,8], index: 6, kind: output, shape index: {}]  }
   0x1   :  { %v39_v0 = vld [vmem:[%s1501_s2] sm:$0xff]  ;;  %v40_v1 = vld [vmem:[%s1501_s2 + $0x8] sm:$0xff]  ;;  %v41_v2 = vld [vmem:[%s1501_s2 + $0x10] sm:$0xff] }
   0x2   :  { %v1098_v3 = vpack.c.bf16 %v40_v1, %v39_v0  ;;  %v42_v4 = vld [vmem:[%s1501_s2 + $0x18] sm:$0xff]  ;;  %v23_v5 = vld [vmem:[%s1502_s1] sm:$0xff]  ;;  %v24_v7 = vld [vmem:[%s1502_s1 + $0x8] sm:$0xff] }
   0x3   :  { %v1102_v6 = vpack.c.bf16 %v42_v4, %v41_v2  ;;  %934 = vmatprep.mubr.msk.f32.mxu0 %vm43_vm0, %v23_v5  ;;  %v25_v8 = vld [vmem:[%s1502_s1 + $0x10] sm:$0xff]  ;;  %v26_v9 = vld [vmem:[%s1502_s1 + $0x18] sm:$0xff]  ;;  %v27_v10 = vld [vmem:[%s1502_s1 + $0x20] sm:$0xff] }
   0x4   :  { %1099 = vmatprep.subr.bf16.mxu0 %v1098_v3  ;;  %v28_v11 = vld [vmem:[%s1502_s1 + $0x28] sm:$0xff]  ;;  %v29_v12 = vld [vmem:[%s1502_s1 + $0x30] sm:$0xff]  ;;  %v30_v13 = vld [vmem:[%s1502_s1 + $0x38] sm:$0xff] }
   0x5   :  { %1101 = vmatpush3.bf16.msra.mxu0 %v1098_v3  ;;  %v31_v14 = vld [vmem:[%s1502_s1 + $0x40] sm:$0xff]  ;;  %v32_v15 = vld [vmem:[%s1502_s1 + $0x48] sm:$0xff]  ;;  %v33_v16 = vld [vmem:[%s1502_s1 + $0x50] sm:$0xff] }
   0x6   :  { %1103 = vmatprep.subr.bf16.mxu0 %v1102_v6  ;;  %v34_v17 = vld [vmem:[%s1502_s1 + $0x58] sm:$0xff]  ;;  %v35_v18 = vld [vmem:[%s1502_s1 + $0x60] sm:$0xff]  ;;  %v36_v19 = vld [vmem:[%s1502_s1 + $0x68] sm:$0xff] }
   0x7   :  { %v37_v20 = vld [vmem:[%s1502_s1 + $0x70] sm:$0xff]  ;;  %v38_v21 = vld [vmem:[%s1502_s1 + $0x78] sm:$0xff]  ;;  %v1304_v22 = vld [vmem:[%s1503_s0] sm:$0xff] }
   0x8   :  { %990 = vmatprep.mubr.f32.mxu1 %v1304_v22  ;;  %v421_v23 = vld [vmem:[%s1504_s4] sm:$0xff]  ;;  %v422_v24 = vld [vmem:[%s1504_s4 + $0x8] sm:$0xff]  ;;  %v1321_v51 = vld [vmem:[%s1503_s0 + $0x10] sm:$0xff] }
   0x9   :  { %1105 = vmatpush3.bf16.msra.mxu0 %v1102_v6  ;;  %v1138_v25 = vpack.c.bf16 %v422_v24, %v421_v23  ;;  %v1316_v50 = vld [vmem:[%s1503_s0 + $0x8] sm:$0xff]  ;;  %v1328_v52 = vld [vmem:[%s1503_s0 + $0x18] sm:$0xff]  ;;  %v1333_v53 = vld [vmem:[%s1503_s0 + $0x20] sm:$0xff] }
   0xa   :  { %v1340_v54 = vld [vmem:[%s1503_s0 + $0x28] sm:$0xff]  ;;  %v243_v55 = vld [vmem:[%s1503_s0 + $0x30] sm:$0xff]  ;;  %v1349_v56 = vld [vmem:[%s1503_s0 + $0x38] sm:$0xff] }
   0xb   :  { %1139 = vmatprep.subr.bf16.mxu0 %v1138_v25  ;;  %v1354_v57 = vld [vmem:[%s1503_s0 + $0x40] sm:$0xff]  ;;  %v1361_v58 = vld [vmem:[%s1503_s0 + $0x48] sm:$0xff]  ;;  %v1366_v59 = vld [vmem:[%s1503_s0 + $0x50] sm:$0xff] }
   0xc   :  { %935 = vmatmul.mubr.msk.f32.vlgmr.msra.gmra.mrb[0].mxu0 %vm43_vm0, %v24_v7  ;;  %v1373_v60 = vld [vmem:[%s1503_s0 + $0x58] sm:$0xff]  ;;  %v1378_v61 = vld [vmem:[%s1503_s0 + $0x60] sm:$0xff]  ;;  %v1385_v62 = vld [vmem:[%s1503_s0 + $0x68] sm:$0xff] }
   0xd   :  { %937 = vmatprep.mubr.msk.f32.mxu0 %vm43_vm0, %v25_v8  ;;  %1141 = vmatpush3.bf16.msra.mxu0 %v1138_v25  ;;  %v1390_v63 = vld [vmem:[%s1503_s0 + $0x70] sm:$0xff]  ;;  %v1397_v0 = vld [vmem:[%s1503_s0 + $0x78] sm:$0xff]  ;;  %v806_v1 = vld [vmem:[%s1505_s3] ss:$0 sm:$0xff] }
  0x10   :  { %938 = vmatmul.mubr.msk.f32.gmra.mrb[2].mxu0 %vm43_vm0, %v26_v9 }
  0x11   :  { %940 = vmatprep.mubr.msk.f32.mxu0 %vm43_vm0, %v27_v10 }
  0x14   :  { %941 = vmatmul.mubr.msk.f32.gmra.mrb[4].mxu0 %vm43_vm0, %v28_v11 }
  0x15   :  { %943 = vmatprep.mubr.msk.f32.mxu0 %vm43_vm0, %v29_v12 }
  0x18   :  { %944 = vmatmul.mubr.msk.f32.gmra.mrb[6].mxu0 %vm43_vm0, %v30_v13 }
  0x19   :  { %946 = vmatprep.mubr.msk.f32.mxu0 %vm43_vm0, %v31_v14 }
  0x1c   :  { %947 = vmatmul.mubr.msk.f32.gmra.mrb[8].mxu0 %vm43_vm0, %v32_v15 }
  0x1d   :  { %949 = vmatprep.mubr.msk.f32.mxu0 %vm43_vm0, %v33_v16 }
  0x20   :  { %950 = vmatmul.mubr.msk.f32.gmra.mrb[10].mxu0 %vm43_vm0, %v34_v17 }
  0x21   :  { %952 = vmatprep.mubr.msk.f32.mxu0 %vm43_vm0, %v35_v18 }
  0x24   :  { %953 = vmatmul.mubr.msk.f32.gmra.mrb[12].mxu0 %vm43_vm0, %v36_v19 }
  0x25   :  { %955 = vmatprep.mubr.msk.f32.mxu0 %vm43_vm0, %v37_v20 }
  0x28   :  { %956 = vmatmul.mubr.msk.f32.gmra.mrb[14].mxu0 %vm43_vm0, %v38_v21 }
  0xdf   :  { %v936_v26 = vpop.f32.mrb[0].mxu0 }
  0xe0   :  { %v158_v27 = vpop.f32.mrb[1].mxu0 }
  0xe1   :  { %v1106_v28 = vpack.c.bf16 %v936_v26, %v158_v27 }
  0xe3   :  { %v939_v29 = vpop.f32.mrb[2].mxu0  ;;  %1107 = vmatprep.subr.bf16.mxu1 %v1106_v28 }
  0xe4   :  { %v168_v30 = vpop.f32.mrb[3].mxu0  ;;  %1109 = vmatpush3.bf16.msra.mxu1 %v1106_v28 }
  0xe5   :  { %v1110_v31 = vpack.c.bf16 %v939_v29, %v168_v30 }
  0xe7   :  { %v942_v32 = vpop.f32.mrb[4].mxu0  ;;  %1111 = vmatprep.subr.bf16.mxu1 %v1110_v31 }
  0xe8   :  { %v178_v33 = vpop.f32.mrb[5].mxu0  ;;  %1113 = vmatpush3.bf16.msra.mxu1 %v1110_v31 }
  0xe9   :  { %v1114_v34 = vpack.c.bf16 %v942_v32, %v178_v33 }
  0xeb   :  { %v945_v35 = vpop.f32.mrb[6].mxu0  ;;  %1115 = vmatprep.subr.bf16.mxu1 %v1114_v34 }
  0xec   :  { %v188_v36 = vpop.f32.mrb[7].mxu0  ;;  %1117 = vmatpush3.bf16.msra.mxu1 %v1114_v34 }
  0xed   :  { %v1118_v37 = vpack.c.bf16 %v945_v35, %v188_v36 }
  0xef   :  { %v948_v38 = vpop.f32.mrb[8].mxu0  ;;  %1119 = vmatprep.subr.bf16.mxu1 %v1118_v37 }
  0xf0   :  { %v198_v39 = vpop.f32.mrb[9].mxu0  ;;  %1121 = vmatpush3.bf16.msra.mxu1 %v1118_v37 }
  0xf1   :  { %v1122_v40 = vpack.c.bf16 %v948_v38, %v198_v39 }
  0xf3   :  { %v951_v41 = vpop.f32.mrb[10].mxu0  ;;  %1123 = vmatprep.subr.bf16.mxu1 %v1122_v40 }
  0xf4   :  { %v208_v42 = vpop.f32.mrb[11].mxu0  ;;  %1125 = vmatpush3.bf16.msra.mxu1 %v1122_v40 }
  0xf5   :  { %v1126_v43 = vpack.c.bf16 %v951_v41, %v208_v42 }
  0xf7   :  { %v954_v44 = vpop.f32.mrb[12].mxu0  ;;  %1127 = vmatprep.subr.bf16.mxu1 %v1126_v43 }
  0xf8   :  { %v218_v45 = vpop.f32.mrb[13].mxu0  ;;  %1129 = vmatpush3.bf16.msra.mxu1 %v1126_v43 }
  0xf9   :  { %v1130_v46 = vpack.c.bf16 %v954_v44, %v218_v45 }
  0xfb   :  { %v957_v47 = vpop.f32.mrb[14].mxu0  ;;  %1131 = vmatprep.subr.bf16.mxu1 %v1130_v46 }
  0xfc   :  { %v228_v48 = vpop.f32.mrb[15].mxu0  ;;  %1133 = vmatpush3.bf16.msra.mxu1 %v1130_v46 }
  0xfd   :  { %v1134_v49 = vpack.c.bf16 %v957_v47, %v228_v48 }
  0xff   :  { %1135 = vmatprep.subr.bf16.mxu1 %v1134_v49 }
 0x100   :  { %1137 = vmatpush3.bf16.msra.mxu1 %v1134_v49 }
 0x103   :  { %991 = vmatmul.mubr.f32.vlgmr.msra.gmra.mrb[0].mxu1 %v1316_v50 }
 0x104   :  { %993 = vmatprep.mubr.f32.mxu1 %v1321_v51 }
 0x107   :  { %994 = vmatmul.mubr.f32.gmra.mrb[2].mxu1 %v1328_v52 }
 0x108   :  { %996 = vmatprep.mubr.f32.mxu1 %v1333_v53 }
 0x10b   :  { %997 = vmatmul.mubr.f32.gmra.mrb[4].mxu1 %v1340_v54 }
 0x10c   :  { %999 = vmatprep.mubr.f32.mxu1 %v243_v55 }
 0x10f   :  { %1000 = vmatmul.mubr.f32.gmra.mrb[6].mxu1 %v1349_v56 }
 0x110   :  { %1002 = vmatprep.mubr.f32.mxu1 %v1354_v57 }
 0x113   :  { %1003 = vmatmul.mubr.f32.gmra.mrb[8].mxu1 %v1361_v58 }
 0x114   :  { %1005 = vmatprep.mubr.f32.mxu1 %v1366_v59 }
 0x117   :  { %1006 = vmatmul.mubr.f32.gmra.mrb[10].mxu1 %v1373_v60 }
 0x118   :  { %1008 = vmatprep.mubr.f32.mxu1 %v1378_v61 }
 0x11b   :  { %1009 = vmatmul.mubr.f32.gmra.mrb[12].mxu1 %v1385_v62 }
 0x11c   :  { %1011 = vmatprep.mubr.f32.mxu1 %v1390_v63 }
 0x11f   :  { %1012 = vmatmul.mubr.f32.gmra.mrb[14].mxu1 %v1397_v0 }
 0x120   :  { %1083 = vmatprep.mubr.f32.mxu1 %v243_v55 }
 0x1d6   :  { %v992_v2 = vpop.f32.mrb[0].mxu1 }
 0x1d7   :  { %v332_v3 = vadd.f32 %v992_v2, %v806_v1  ;;  %v326_v4 = vpop.f32.mrb[1].mxu1 }
 0x1d8   :  { %v327_v5 = vadd.f32 %v806_v1, %v326_v4 }
 0x1d9   :  { %v406_v8 = vmax.f32 %v332_v3, 0.0 }
 0x1da   :  { %v405_v6 = vmax.f32 %v327_v5, 0.0  ;;  %v995_v7 = vpop.f32.mrb[2].mxu1 }
 0x1db   :  { %v342_v9 = vadd.f32 %v995_v7, %v806_v1  ;;  %v336_v10 = vpop.f32.mrb[3].mxu1 }
 0x1dc   :  { %v337_v11 = vadd.f32 %v806_v1, %v336_v10  ;;  %1018 = vmatprep.mubr.msk.f32.mxu0 %vm423_vm1, %v405_v6 }
 0x1dd   :  { %1019 = vmatmul.mubr.msk.f32.vlgmr.msra.gmra.mrb[16].mxu0 %vm423_vm1, %v406_v8  ;;  %v408_v14 = vmax.f32 %v342_v9, 0.0 }
 0x1de   :  { %v407_v12 = vmax.f32 %v337_v11, 0.0  ;;  %v998_v13 = vpop.f32.mrb[4].mxu1 }
 0x1df   :  { %v352_v15 = vadd.f32 %v998_v13, %v806_v1  ;;  %v346_v16 = vpop.f32.mrb[5].mxu1 }
 0x1e0   :  { %v347_v17 = vadd.f32 %v806_v1, %v346_v16  ;;  %1021 = vmatprep.mubr.msk.f32.mxu0 %vm423_vm1, %v407_v12 }
 0x1e1   :  { %1022 = vmatmul.mubr.msk.f32.gmra.mrb[18].mxu0 %vm423_vm1, %v408_v14  ;;  %v410_v20 = vmax.f32 %v352_v15, 0.0 }
 0x1e2   :  { %v409_v18 = vmax.f32 %v347_v17, 0.0  ;;  %v1001_v19 = vpop.f32.mrb[6].mxu1 }
 0x1e3   :  { %v362_v21 = vadd.f32 %v1001_v19, %v806_v1  ;;  %v356_v23 = vpop.f32.mrb[7].mxu1 }
 0x1e4   :  { %v357_v24 = vadd.f32 %v806_v1, %v356_v23  ;;  %1024 = vmatprep.mubr.msk.f32.mxu0 %vm423_vm1, %v409_v18 }
 0x1e5   :  { %1025 = vmatmul.mubr.msk.f32.gmra.mrb[20].mxu0 %vm423_vm1, %v410_v20  ;;  %v412_v27 = vmax.f32 %v362_v21, 0.0 }
 0x1e6   :  { %v411_v25 = vmax.f32 %v357_v24, 0.0  ;;  %v1004_v26 = vpop.f32.mrb[8].mxu1 }
 0x1e7   :  { %v372_v28 = vadd.f32 %v1004_v26, %v806_v1  ;;  %v366_v29 = vpop.f32.mrb[9].mxu1 }
 0x1e8   :  { %v367_v30 = vadd.f32 %v806_v1, %v366_v29  ;;  %1027 = vmatprep.mubr.msk.f32.mxu0 %vm423_vm1, %v411_v25 }
 0x1e9   :  { %1028 = vmatmul.mubr.msk.f32.gmra.mrb[22].mxu0 %vm423_vm1, %v412_v27  ;;  %v414_v33 = vmax.f32 %v372_v28, 0.0 }
 0x1ea   :  { %v413_v31 = vmax.f32 %v367_v30, 0.0  ;;  %v1007_v32 = vpop.f32.mrb[10].mxu1 }
 0x1eb   :  { %v382_v34 = vadd.f32 %v1007_v32, %v806_v1  ;;  %v376_v35 = vpop.f32.mrb[11].mxu1 }
 0x1ec   :  { %v377_v36 = vadd.f32 %v806_v1, %v376_v35  ;;  %1030 = vmatprep.mubr.msk.f32.mxu0 %vm423_vm1, %v413_v31 }
 0x1ed   :  { %1031 = vmatmul.mubr.msk.f32.gmra.mrb[24].mxu0 %vm423_vm1, %v414_v33  ;;  %v416_v39 = vmax.f32 %v382_v34, 0.0 }
 0x1ee   :  { %v415_v37 = vmax.f32 %v377_v36, 0.0  ;;  %v1010_v38 = vpop.f32.mrb[12].mxu1 }
 0x1ef   :  { %v392_v40 = vadd.f32 %v1010_v38, %v806_v1  ;;  %v386_v41 = vpop.f32.mrb[13].mxu1 }
 0x1f0   :  { %v387_v42 = vadd.f32 %v806_v1, %v386_v41  ;;  %1033 = vmatprep.mubr.msk.f32.mxu0 %vm423_vm1, %v415_v37 }
 0x1f1   :  { %1034 = vmatmul.mubr.msk.f32.gmra.mrb[26].mxu0 %vm423_vm1, %v416_v39  ;;  %v418_v45 = vmax.f32 %v392_v40, 0.0 }
 0x1f2   :  { %v417_v43 = vmax.f32 %v387_v42, 0.0  ;;  %v1013_v44 = vpop.f32.mrb[14].mxu1 }
 0x1f3   :  { %v402_v46 = vadd.f32 %v1013_v44, %v806_v1  ;;  %v396_v47 = vpop.f32.mrb[15].mxu1 }
 0x1f4   :  { %v397_v48 = vadd.f32 %v806_v1, %v396_v47  ;;  %1036 = vmatprep.mubr.msk.f32.mxu0 %vm423_vm1, %v417_v43 }
 0x1f5   :  { %1037 = vmatmul.mubr.msk.f32.gmra.mrb[28].mxu0 %vm423_vm1, %v418_v45  ;;  %v420_v55 = vmax.f32 %v402_v46, 0.0 }
 0x1f6   :  { %v419_v49 = vmax.f32 %v397_v48, 0.0 }
 0x1f8   :  { %1039 = vmatprep.mubr.msk.f32.mxu0 %vm423_vm1, %v419_v49 }
 0x1f9   :  { %1040 = vmatmul.mubr.msk.f32.gmra.mrb[30].mxu0 %vm423_vm1, %v420_v55 }
 0x1fa   :  { %1074 = vmatprep.mubr.f32.mxu0 %v1304_v22 }
 0x2b0   :  { %v1020_v2 = vpop.f32.mrb[16].mxu0 }
 0x2b1   :  { %v538_v3 = vpop.f32.mrb[17].mxu0 }
 0x2b2   :  { %v1142_v4 = vpack.c.bf16 %v1020_v2, %v538_v3 }
 0x2b4   :  { %v1023_v5 = vpop.f32.mrb[18].mxu0  ;;  %1143 = vmatprep.subr.bf16.mxu0 %v1142_v4  ;;  %1174 = vmatprep.subr.bf16.mxu1 %v1142_v4 }
 0x2b5   :  { %v548_v6 = vpop.f32.mrb[19].mxu0  ;;  %1145 = vmatpush3.bf16.msra.mxu0 %v1142_v4  ;;  %1182 = vmatpush3.bf16.msra.mxu1 %v1142_v4 }
 0x2b6   :  { %v1146_v1 = vpack.c.bf16 %v1023_v5, %v548_v6 }
 0x2b8   :  { %v1026_v7 = vpop.f32.mrb[20].mxu0  ;;  %1147 = vmatprep.subr.bf16.mxu0 %v1146_v1  ;;  %1175 = vmatprep.subr.bf16.mxu1 %v1146_v1 }
 0x2b9   :  { %v558_v8 = vpop.f32.mrb[21].mxu0  ;;  %1149 = vmatpush3.bf16.msra.mxu0 %v1146_v1  ;;  %1183 = vmatpush3.bf16.msra.mxu1 %v1146_v1 }
 0x2ba   :  { %v1150_v9 = vpack.c.bf16 %v1026_v7, %v558_v8 }
 0x2bc   :  { %v1029_v10 = vpop.f32.mrb[22].mxu0  ;;  %1151 = vmatprep.subr.bf16.mxu0 %v1150_v9  ;;  %1176 = vmatprep.subr.bf16.mxu1 %v1150_v9 }
 0x2bd   :  { %v568_v22 = vpop.f32.mrb[23].mxu0  ;;  %1153 = vmatpush3.bf16.msra.mxu0 %v1150_v9  ;;  %1184 = vmatpush3.bf16.msra.mxu1 %v1150_v9 }
 0x2be   :  { %v1154_v11 = vpack.c.bf16 %v1029_v10, %v568_v22 }
 0x2c0   :  { %v1032_v12 = vpop.f32.mrb[24].mxu0  ;;  %1155 = vmatprep.subr.bf16.mxu0 %v1154_v11  ;;  %1177 = vmatprep.subr.bf16.mxu1 %v1154_v11 }
 0x2c1   :  { %v578_v13 = vpop.f32.mrb[25].mxu0  ;;  %1157 = vmatpush3.bf16.msra.mxu0 %v1154_v11  ;;  %1185 = vmatpush3.bf16.msra.mxu1 %v1154_v11 }
 0x2c2   :  { %v1158_v14 = vpack.c.bf16 %v1032_v12, %v578_v13 }
 0x2c4   :  { %v1035_v15 = vpop.f32.mrb[26].mxu0  ;;  %1159 = vmatprep.subr.bf16.mxu0 %v1158_v14  ;;  %1178 = vmatprep.subr.bf16.mxu1 %v1158_v14 }
 0x2c5   :  { %v588_v16 = vpop.f32.mrb[27].mxu0  ;;  %1161 = vmatpush3.bf16.msra.mxu0 %v1158_v14  ;;  %1186 = vmatpush3.bf16.msra.mxu1 %v1158_v14 }
 0x2c6   :  { %v1162_v17 = vpack.c.bf16 %v1035_v15, %v588_v16 }
 0x2c8   :  { %v1038_v18 = vpop.f32.mrb[28].mxu0  ;;  %1163 = vmatprep.subr.bf16.mxu0 %v1162_v17  ;;  %1179 = vmatprep.subr.bf16.mxu1 %v1162_v17 }
 0x2c9   :  { %v598_v19 = vpop.f32.mrb[29].mxu0  ;;  %1165 = vmatpush3.bf16.msra.mxu0 %v1162_v17  ;;  %1187 = vmatpush3.bf16.msra.mxu1 %v1162_v17 }
 0x2ca   :  { %v1166_v20 = vpack.c.bf16 %v1038_v18, %v598_v19 }
 0x2cc   :  { %v1041_v21 = vpop.f32.mrb[30].mxu0  ;;  %1167 = vmatprep.subr.bf16.mxu0 %v1166_v20  ;;  %1180 = vmatprep.subr.bf16.mxu1 %v1166_v20 }
 0x2cd   :  { %v608_v23 = vpop.f32.mrb[31].mxu0  ;;  %1169 = vmatpush3.bf16.msra.mxu0 %v1166_v20  ;;  %1188 = vmatpush3.bf16.msra.mxu1 %v1166_v20 }
 0x2ce   :  { %v1170_v24 = vpack.c.bf16 %v1041_v21, %v608_v23 }
 0x2d0   :  { %1171 = vmatprep.subr.bf16.mxu0 %v1170_v24  ;;  %1181 = vmatprep.subr.bf16.mxu1 %v1170_v24 }
 0x2d1   :  { %1173 = vmatpush3.bf16.msra.mxu0 %v1170_v24  ;;  %1189 = vmatpush3.bf16.msra.mxu1 %v1170_v24 }
 0x2d4   :  { %1084 = vmatmul.mubr.f32.vlgmr.msra.gmra.mrb[16].mxu1 %v1349_v56  ;;  %1075 = vmatmul.mubr.f32.vlgmr.msra.gmra.mrb[32].mxu0 %v1316_v50  ;;  %v823_v50 = vld [vmem:[%s1506_s5] ss:$0 sm:$0xff] }
 0x2d5   :  { %1086 = vmatprep.mubr.f32.mxu1 %v1354_v57  ;;  %1077 = vmatprep.mubr.f32.mxu0 %v1321_v51 }
 0x2d8   :  { %1087 = vmatmul.mubr.f32.gmra.mrb[18].mxu1 %v1361_v58  ;;  %1078 = vmatmul.mubr.f32.gmra.mrb[34].mxu0 %v1328_v52 }
 0x2d9   :  { %1089 = vmatprep.mubr.f32.mxu1 %v1366_v59  ;;  %1080 = vmatprep.mubr.f32.mxu0 %v1333_v53 }
 0x2dc   :  { %1090 = vmatmul.mubr.f32.gmra.mrb[20].mxu1 %v1373_v60  ;;  %1081 = vmatmul.mubr.f32.gmra.mrb[36].mxu0 %v1340_v54 }
 0x2dd   :  { %1092 = vmatprep.mubr.f32.mxu1 %v1378_v61 }
 0x2e0   :  { %1093 = vmatmul.mubr.f32.gmra.mrb[22].mxu1 %v1385_v62 }
 0x2e1   :  { %1095 = vmatprep.mubr.f32.mxu1 %v1390_v63 }
 0x2e4   :  { %1096 = vmatmul.mubr.f32.gmra.mrb[24].mxu1 %v1397_v0 }
 0x3a7   :  { %v1085_v51 = vpop.f32.mrb[16].mxu1  ;;  %v1076_v52 = vpop.f32.mrb[32].mxu0 }
 0x3a8   :  { %v726_v53 = vadd.f32 %v1085_v51, %v823_v50  ;;  %v720_v56 = vpop.f32.mrb[17].mxu1  ;;  %v696_v57 = vadd.f32 %v1076_v52, %v823_v50  ;;  %v690_v58 = vpop.f32.mrb[33].mxu0 }
 0x3a9   :  { %v721_v54 = vadd.f32 %v823_v50, %v720_v56  ;;  %v691_v59 = vadd.f32 %v823_v50, %v690_v58 }
 0x3aa   :  { %777 = vst.msk [vmem:[%s1507_s6 + $0x38] sm:$0xff] %vm769_vm2, %v726_v53  ;;  %771 = vst.msk [vmem:[%s1507_s6 + $0x8] sm:$0xff] %vm769_vm2, %v696_v57 }
 0x3ab   :  { %776 = vst.msk [vmem:[%s1507_s6 + $0x30] sm:$0xff] %vm769_vm2, %v721_v54  ;;  %v1088_v60 = vpop.f32.mrb[18].mxu1  ;;  %770 = vst.msk [vmem:[%s1507_s6] sm:$0xff] %vm769_vm2, %v691_v59  ;;  %v1079_v61 = vpop.f32.mrb[34].mxu0 }
 0x3ac   :  { %v736_v62 = vadd.f32 %v1088_v60, %v823_v50  ;;  %v730_v63 = vpop.f32.mrb[19].mxu1  ;;  %v706_v0 = vadd.f32 %v1079_v61, %v823_v50  ;;  %v700_v25 = vpop.f32.mrb[35].mxu0 }
 0x3ad   :  { %v731_v26 = vadd.f32 %v823_v50, %v730_v63  ;;  %v701_v27 = vadd.f32 %v823_v50, %v700_v25 }
 0x3ae   :  { %779 = vst.msk [vmem:[%s1507_s6 + $0x48] sm:$0xff] %vm769_vm2, %v736_v62  ;;  %773 = vst.msk [vmem:[%s1507_s6 + $0x18] sm:$0xff] %vm769_vm2, %v706_v0 }
 0x3af   :  { %778 = vst.msk [vmem:[%s1507_s6 + $0x40] sm:$0xff] %vm769_vm2, %v731_v26  ;;  %v1091_v28 = vpop.f32.mrb[20].mxu1  ;;  %772 = vst.msk [vmem:[%s1507_s6 + $0x10] sm:$0xff] %vm769_vm2, %v701_v27  ;;  %v1082_v29 = vpop.f32.mrb[36].mxu0 }
 0x3b0   :  { %v746_v30 = vadd.f32 %v1091_v28, %v823_v50  ;;  %v740_v31 = vpop.f32.mrb[21].mxu1  ;;  %v716_v32 = vadd.f32 %v1082_v29, %v823_v50  ;;  %v710_v33 = vpop.f32.mrb[37].mxu0 }
 0x3b1   :  { %v741_v34 = vadd.f32 %v823_v50, %v740_v31  ;;  %v711_v35 = vadd.f32 %v823_v50, %v710_v33 }
 0x3b2   :  { %781 = vst.msk [vmem:[%s1507_s6 + $0x58] sm:$0xff] %vm769_vm2, %v746_v30  ;;  %775 = vst.msk [vmem:[%s1507_s6 + $0x28] sm:$0xff] %vm769_vm2, %v716_v32 }
 0x3b3   :  { %780 = vst.msk [vmem:[%s1507_s6 + $0x50] sm:$0xff] %vm769_vm2, %v741_v34  ;;  %v1094_v36 = vpop.f32.mrb[22].mxu1  ;;  %774 = vst.msk [vmem:[%s1507_s6 + $0x20] sm:$0xff] %vm769_vm2, %v711_v35 }
 0x3b4   :  { %v756_v37 = vadd.f32 %v1094_v36, %v823_v50  ;;  %v750_v38 = vpop.f32.mrb[23].mxu1 }
 0x3b5   :  { %v751_v39 = vadd.f32 %v823_v50, %v750_v38 }
 0x3b6   :  { %783 = vst.msk [vmem:[%s1507_s6 + $0x68] sm:$0xff] %vm769_vm2, %v756_v37 }
 0x3b7   :  { %782 = vst.msk [vmem:[%s1507_s6 + $0x60] sm:$0xff] %vm769_vm2, %v751_v39  ;;  %v1097_v40 = vpop.f32.mrb[24].mxu1 }
 0x3b8   :  { %v766_v41 = vadd.f32 %v1097_v40, %v823_v50  ;;  %v760_v42 = vpop.f32.mrb[25].mxu1 }
 0x3b9   :  { %v761_v43 = vadd.f32 %v823_v50, %v760_v42 }
 0x3ba   :  { %785 = vst.msk [vmem:[%s1507_s6 + $0x78] sm:$0xff] %vm769_vm2, %v766_v41 }
 0x3bb   :  { %784 = vst.msk [vmem:[%s1507_s6 + $0x70] sm:$0xff] %vm769_vm2, %v761_v43 }

</bundles_post_ra>
